<compile_context>
chip_gen: v6e
topology: v6e:2x2x1
jax: 0.10.0
libtpu: 0.0.40
codegen_flags: <defaults>
</compile_context>

<pallas_src>
import functools

import jax
import jax.numpy as jnp
from jax.experimental import pallas as pl
from jax.experimental.pallas import tpu as pltpu


_MASK_FILL = -1e30  # finite "-inf": exp underflows to 0, fully-masked rows stay NaN-free


def _sdpa_kernel(*refs, scale, block_k, num_k, has_mask):
    if has_mask:
        (q_ref, k_ref, v_ref, mask_ref,
         ctx_ref, attn_ref, m_ref, l_ref, acc_ref, s_ref) = refs
    else:
        (q_ref, k_ref, v_ref,
         ctx_ref, attn_ref, m_ref, l_ref, acc_ref, s_ref) = refs
        mask_ref = None

    ki = pl.program_id(2)

    @pl.when(ki == 0)
    def _init():
        m_ref[...] = jnp.full_like(m_ref, -jnp.inf)
        l_ref[...] = jnp.zeros_like(l_ref)
        acc_ref[...] = jnp.zeros_like(acc_ref)

    q = q_ref[0]                       # (TQ, D), native dtype
    if scale is not None:
        q = q * scale                  # fold scale into q: O(TQ*D) instead of O(TQ*TK)
    k = k_ref[0]                       # (TK, D)
    v = v_ref[0]                       # (TK, D_v)

    # scores = q @ k^T without materializing a transpose: contract last dims.
    s = jax.lax.dot_general(
        q, k, (((1,), (1,)), ((), ())),
        preferred_element_type=jnp.float32)            # (TQ, TK) f32

    if mask_ref is not None:
        s = jnp.where(mask_ref[0] != 0, _MASK_FILL, s)

    # Stage raw (scaled, masked) scores for the attention-matrix finalize.
    s_ref[ki] = s

    # Online softmax update (flash-attention accumulator).
    m_prev = m_ref[...]                                 # (TQ, 1)
    m_new = jnp.maximum(m_prev, jnp.max(s, axis=-1, keepdims=True))
    alpha = jnp.exp(m_prev - m_new)                     # rescale factor for old state
    p = jnp.exp(s - m_new)                              # (TQ, TK) f32

    l_ref[...] = alpha * l_ref[...] + jnp.sum(p, axis=-1, keepdims=True)
    acc_ref[...] = alpha * acc_ref[...] + jax.lax.dot_general(
        p.astype(v.dtype), v, (((1,), (0,)), ((), ())),
        preferred_element_type=jnp.float32)
    m_ref[...] = m_new

    @pl.when(ki == num_k - 1)
    def _finalize():
        inv_l = pl.reciprocal(l_ref[...], approx=True)  # EUP slot, effectively free
        ctx_ref[0] = (acc_ref[...] * inv_l).astype(ctx_ref.dtype)
        m_fin = m_ref[...]
        # Static (unrolled) chunk loop -> static lane slices into the resident
        # (TQ, L_k) attention output block.
        for j in range(num_k):
            pj = jnp.exp(s_ref[j] - m_fin) * inv_l
            attn_ref[0, :, j * block_k:(j + 1) * block_k] = pj.astype(attn_ref.dtype)


def _choose_tile(dim, target, align):
    """Largest power-of-two tile <= target that divides dim, else the full dim."""
    if dim <= target:
        return dim
    t = target
    while t >= align and dim % t:
        t //= 2
    return t if (t >= align and dim % t == 0) else dim


def scaled_dot_product_attention(q, k, v, scale=None, attn_mask=None, *,
                                 block_q=256, block_k=512, attn_dtype=None):
    """q: [B, L_q, D], k: [B, L_k, D], v: [B, L_k, D_v], attn_mask: [B, L_q, L_k] (0/1).

    Returns (context [B, L_q, D_v], attention [B, L_q, L_k]).
    """
    B, L_q, D = q.shape
    _, L_k, _ = k.shape
    _, _, D_v = v.shape

    tq = _choose_tile(L_q, block_q, 8)     # sublane-aligned q tile
    tk = _choose_tile(L_k, block_k, 128)   # lane-aligned k tile
    nq = L_q // tq
    nk = L_k // tk

    attn_dtype = q.dtype if attn_dtype is None else attn_dtype
    has_mask = attn_mask is not None

    kernel = functools.partial(_sdpa_kernel, scale=scale, block_k=tk,
                               num_k=nk, has_mask=has_mask)

    in_specs = [
        pl.BlockSpec((1, tq, D), lambda b, qi, ki: (b, qi, 0)),
        pl.BlockSpec((1, tk, D), lambda b, qi, ki: (b, ki, 0)),
        pl.BlockSpec((1, tk, D_v), lambda b, qi, ki: (b, ki, 0)),
    ]
    args = [q, k, v]
    if has_mask:
        in_specs.append(pl.BlockSpec((1, tq, tk), lambda b, qi, ki: (b, qi, ki)))
        args.append(attn_mask.astype(jnp.int8))   # 4x less DMA than int32

    out_specs = [
        pl.BlockSpec((1, tq, D_v), lambda b, qi, ki: (b, qi, 0)),   # ctx, resident over k
        pl.BlockSpec((1, tq, L_k), lambda b, qi, ki: (b, qi, 0)),   # attn, resident over k
    ]
    out_shape = (
        jax.ShapeDtypeStruct((B, L_q, D_v), q.dtype),
        jax.ShapeDtypeStruct((B, L_q, L_k), attn_dtype),
    )

    scratch_shapes = [
        pltpu.VMEM((tq, 1), jnp.float32),        # running max m
        pltpu.VMEM((tq, 1), jnp.float32),        # running denominator l
        pltpu.VMEM((tq, D_v), jnp.float32),      # context accumulator
        pltpu.VMEM((nk, tq, tk), jnp.float32),   # staged raw scores (for attn output)
    ]

    # Explicit VMEM budget: double-buffered blocks + scratch + slack.
    isz = jnp.dtype(q.dtype).itemsize
    block_bytes = (tq * D * isz + tk * D * isz + tk * D_v * isz
                   + (tq * tk if has_mask else 0)
                   + tq * D_v * isz + tq * L_k * jnp.dtype(attn_dtype).itemsize)
    scratch_bytes = 4 * (tq * (2 + D_v) + nk * tq * tk)
    vmem_limit = int(min(max(2 * block_bytes + scratch_bytes + (8 << 20), 32 << 20),
                         96 << 20))

    ctx, attn = pl.pallas_call(
        kernel,
        out_shape=out_shape,
        grid_spec=pltpu.PrefetchScalarGridSpec(
            num_scalar_prefetch=0,
            grid=(B, nq, nk),
            in_specs=in_specs,
            out_specs=out_specs,
            scratch_shapes=scratch_shapes,
        ),
        compiler_params=pltpu.CompilerParams(
            dimension_semantics=("parallel", "parallel", "arbitrary"),
            vmem_limit_bytes=vmem_limit,
        ),
    )(*args)
    return ctx, attn


def _reference(q, k, v, scale=None, attn_mask=None):
    qf = q.astype(jnp.float32)
    if scale is not None:
        qf = qf * scale    # mathematically identical to scaling scores; matches kernel numerics
    s = jnp.einsum("bqd,bkd->bqk", qf, k.astype(jnp.float32))
    if attn_mask is not None:
        s = jnp.where(attn_mask != 0, _MASK_FILL, s)
    attn = jax.nn.softmax(s, axis=2)
    ctx = jnp.einsum("bqk,bkd->bqd", attn, v.astype(jnp.float32))
    return ctx.astype(q.dtype), attn.astype(q.dtype)


if __name__ == "__main__":
    def _run_case(B, L_q, L_k, D, D_v, block_q, block_k):
        key = jax.random.PRNGKey(0)
        kq, kk, kv, km = jax.random.split(key, 4)
        q = jax.random.normal(kq, (B, L_q, D), dtype=jnp.float32)
        k = jax.random.normal(kk, (B, L_k, D), dtype=jnp.float32)
        v = jax.random.normal(kv, (B, L_k, D_v), dtype=jnp.float32)
        attn_mask = (jax.random.uniform(km, (B, L_q, L_k)) < 0.2).astype(jnp.int8)
        scale = 1.0 / (D ** 0.5)

        ctx, attn = scaled_dot_product_attention(
            q, k, v, scale=scale, attn_mask=attn_mask,
            block_q=block_q, block_k=block_k)
        jax.block_until_ready((ctx, attn))

        ctx_ref, attn_ref = _reference(q, k, v, scale=scale, attn_mask=attn_mask)
        # Tolerance covers the approx (EUP) reciprocal in the softmax normalization
        # and MXU default-precision accumulation-order differences.
        assert jnp.allclose(ctx, ctx_ref, atol=1e-2, rtol=1e-2), "context mismatch"
        assert jnp.allclose(attn, attn_ref, atol=1e-2, rtol=1e-2), "attention mismatch"

    # Small shapes from the module spec (single tile, nk == 1).
    _run_case(B=2, L_q=8, L_k=8, D=32, D_v=32, block_q=256, block_k=512)
    # Slightly larger case exercising q/k tiling + the online-softmax path (grid 2x2x2).
    _run_case(B=2, L_q=256, L_k=256, D=128, D_v=128, block_q=128, block_k=128)

    print("KERNEL_OK")
</pallas_src>

<mosaic_0001>
module attributes {stable_mosaic.version = 11 : i64} {
  func.func @_sdpa_kernel(%arg0: i32, %arg1: i32, %arg2: i32, %arg3: memref<1x8x32xf32, #tpu.memory_space<vmem>>, %arg4: memref<1x8x32xf32, #tpu.memory_space<vmem>>, %arg5: memref<1x8x32xf32, #tpu.memory_space<vmem>>, %arg6: memref<1x8x8xi8, #tpu.memory_space<vmem>>, %arg7: memref<1x8x32xf32, #tpu.memory_space<vmem>>, %arg8: memref<1x8x8xf32, #tpu.memory_space<vmem>>, %arg9: memref<8x1xf32, #tpu.memory_space<vmem>>, %arg10: memref<8x1xf32, #tpu.memory_space<vmem>>, %arg11: memref<8x32xf32, #tpu.memory_space<vmem>>, %arg12: memref<1x8x8xf32, #tpu.memory_space<vmem>>) attributes {dimension_semantics = [#tpu.dimension_semantics<parallel>, #tpu.dimension_semantics<parallel>, #tpu.dimension_semantics<arbitrary>], iteration_bounds = array<i64: 2, 1, 1>, scalar_prefetch = 0 : i64, scratch_operands = 4 : i64, tpu.core_type = #tpu.core_type<tc>, window_params = [{transform_indices = @transform_0, window_bounds = array<i64: 1, 8, 32>}, {transform_indices = @transform_1, window_bounds = array<i64: 1, 8, 32>}, {transform_indices = @transform_2, window_bounds = array<i64: 1, 8, 32>}, {transform_indices = @transform_3, window_bounds = array<i64: 1, 8, 8>}, {transform_indices = @transform_4, window_bounds = array<i64: 1, 8, 32>}, {transform_indices = @transform_5, window_bounds = array<i64: 1, 8, 8>}]} {
    %c0_i32 = arith.constant 0 : i32
    %0 = arith.cmpi eq, %arg2, %c0_i32 : i32
    %1 = arith.extui %0 : i1 to i32
    %c0_i32_0 = arith.constant 0 : i32
    %2 = arith.cmpi ne, %1, %c0_i32_0 : i32
    scf.if %2 {
      %cst_33 = arith.constant 0xFF800000 : f32
      %47 = vector.broadcast %cst_33 : f32 to vector<8x1xf32>
      %c0_34 = arith.constant 0 : index
      %c0_35 = arith.constant 0 : index
      %48 = vector.load %arg9[%c0_34, %c0_35] : memref<8x1xf32, #tpu.memory_space<vmem>>, vector<8x1xf32>
      tpu.vector_store %arg9[%c0_34, %c0_35], %47 {strides = array<i32>} : memref<8x1xf32, #tpu.memory_space<vmem>>, vector<8x1xf32>,
      %cst_36 = arith.constant 0.000000e+00 : f32
      %49 = vector.broadcast %cst_36 : f32 to vector<8x1xf32>
      %c0_37 = arith.constant 0 : index
      %c0_38 = arith.constant 0 : index
      %50 = vector.load %arg10[%c0_37, %c0_38] : memref<8x1xf32, #tpu.memory_space<vmem>>, vector<8x1xf32>
      tpu.vector_store %arg10[%c0_37, %c0_38], %49 {strides = array<i32>} : memref<8x1xf32, #tpu.memory_space<vmem>>, vector<8x1xf32>,
      %cst_39 = arith.constant 0.000000e+00 : f32
      %51 = vector.broadcast %cst_39 : f32 to vector<8x32xf32>
      %c0_40 = arith.constant 0 : index
      %c0_41 = arith.constant 0 : index
      %52 = vector.load %arg11[%c0_40, %c0_41] : memref<8x32xf32, #tpu.memory_space<vmem>>, vector<8x32xf32>
      tpu.vector_store %arg11[%c0_40, %c0_41], %51 {strides = array<i32>} : memref<8x32xf32, #tpu.memory_space<vmem>>, vector<8x32xf32>,
    } else {
    }
    %c0 = arith.constant 0 : index
    %c0_1 = arith.constant 0 : index
    %c0_2 = arith.constant 0 : index
    %3 = vector.load %arg3[%c0, %c0_1, %c0_2] : memref<1x8x32xf32, #tpu.memory_space<vmem>>, vector<1x8x32xf32>
    %4 = vector.shape_cast %3 : vector<1x8x32xf32> to vector<8x32xf32>
    %cst = arith.constant 0.176776692 : f32
    %5 = vector.broadcast %cst : f32 to vector<8x32xf32>
    %6 = arith.mulf %4, %5 : vector<8x32xf32>
    %c0_3 = arith.constant 0 : index
    %c0_4 = arith.constant 0 : index
    %c0_5 = arith.constant 0 : index
    %7 = vector.load %arg4[%c0_3, %c0_4, %c0_5] : memref<1x8x32xf32, #tpu.memory_space<vmem>>, vector<1x8x32xf32>
    %8 = vector.shape_cast %7 : vector<1x8x32xf32> to vector<8x32xf32>
    %c0_6 = arith.constant 0 : index
    %c0_7 = arith.constant 0 : index
    %c0_8 = arith.constant 0 : index
    %9 = vector.load %arg5[%c0_6, %c0_7, %c0_8] : memref<1x8x32xf32, #tpu.memory_space<vmem>>, vector<1x8x32xf32>
    %10 = vector.shape_cast %9 : vector<1x8x32xf32> to vector<8x32xf32>
    %cst_9 = arith.constant dense<0.000000e+00> : vector<8x8xf32>
    %11 = tpu.matmul %6, %8, %cst_9 {dimension_numbers = #tpu.dot_dimension_numbers<[1], [1], [0], [0], [0, 0, 1, 0], [], []>} : vector<8x32xf32>, vector<8x32xf32>, vector<8x8xf32> -> vector<8x8xf32>
    %c0_10 = arith.constant 0 : index
    %c0_11 = arith.constant 0 : index
    %c0_12 = arith.constant 0 : index
    %12 = vector.load %arg6[%c0_10, %c0_11, %c0_12] : memref<1x8x8xi8, #tpu.memory_space<vmem>>, vector<1x8x8xi8>
    %13 = vector.shape_cast %12 : vector<1x8x8xi8> to vector<8x8xi8>
    %c0_i8 = arith.constant 0 : i8
    %14 = vector.broadcast %c0_i8 : i8 to vector<8x8xi8>
    %15 = arith.cmpi ne, %13, %14 : vector<8x8xi8>
    %cst_13 = arith.constant -1.000000e+30 : f32
    %16 = vector.broadcast %cst_13 : f32 to vector<8x8xf32>
    %17 = arith.select %15, %16, %11 : vector<8x8xi1>, vector<8x8xf32>
    %18 = arith.index_cast %arg2 : i32 to index
    %c0_14 = arith.constant 0 : index
    %c0_15 = arith.constant 0 : index
    %19 = vector.load %arg12[%18, %c0_14, %c0_15] : memref<1x8x8xf32, #tpu.memory_space<vmem>>, vector<1x8x8xf32>
    %20 = vector.shape_cast %19 : vector<1x8x8xf32> to vector<8x8xf32>
    %21 = vector.shape_cast %17 : vector<8x8xf32> to vector<1x8x8xf32>
    tpu.vector_store %arg12[%18, %c0_14, %c0_15], %21 {strides = array<i32>} : memref<1x8x8xf32, #tpu.memory_space<vmem>>, vector<1x8x8xf32>,
    %c0_16 = arith.constant 0 : index
    %c0_17 = arith.constant 0 : index
    %22 = vector.load %arg9[%c0_16, %c0_17] : memref<8x1xf32, #tpu.memory_space<vmem>>, vector<8x1xf32>
    %cst_18 = arith.constant dense<0xFF800000> : vector<8xf32>
    %23 = vector.multi_reduction <maximumf>, %17, %cst_18 [1] : vector<8x8xf32> to vector<8xf32>
    %24 = vector.shape_cast %23 : vector<8xf32> to vector<8x1xf32>
    %25 = arith.maximumf %22, %24 : vector<8x1xf32>
    %26 = arith.subf %22, %25 : vector<8x1xf32>
    %27 = math.exp %26 : vector<8x1xf32>
    %28 = vector.broadcast %25 : vector<8x1xf32> to vector<8x8xf32>
    %29 = arith.subf %17, %28 : vector<8x8xf32>
    %30 = math.exp %29 : vector<8x8xf32>
    %c0_19 = arith.constant 0 : index
    %c0_20 = arith.constant 0 : index
    %31 = vector.load %arg10[%c0_19, %c0_20] : memref<8x1xf32, #tpu.memory_space<vmem>>, vector<8x1xf32>
    %32 = arith.mulf %27, %31 : vector<8x1xf32>
    %cst_21 = arith.constant dense<0.000000e+00> : vector<8xf32>
    %33 = vector.multi_reduction <add>, %30, %cst_21 [1] : vector<8x8xf32> to vector<8xf32>
    %34 = vector.shape_cast %33 : vector<8xf32> to vector<8x1xf32>
    %35 = arith.addf %32, %34 : vector<8x1xf32>
    %c0_22 = arith.constant 0 : index
    %c0_23 = arith.constant 0 : index
    %36 = vector.load %arg10[%c0_22, %c0_23] : memref<8x1xf32, #tpu.memory_space<vmem>>, vector<8x1xf32>
    tpu.vector_store %arg10[%c0_22, %c0_23], %35 {strides = array<i32>} : memref<8x1xf32, #tpu.memory_space<vmem>>, vector<8x1xf32>,
    %c0_24 = arith.constant 0 : index
    %c0_25 = arith.constant 0 : index
    %37 = vector.load %arg11[%c0_24, %c0_25] : memref<8x32xf32, #tpu.memory_space<vmem>>, vector<8x32xf32>
    %38 = vector.broadcast %27 : vector<8x1xf32> to vector<8x32xf32>
    %39 = arith.mulf %38, %37 : vector<8x32xf32>
    %cst_26 = arith.constant dense<0.000000e+00> : vector<8x32xf32>
    %40 = tpu.matmul %30, %10, %cst_26 {dimension_numbers = #tpu.dot_dimension_numbers<[1], [0], [0], [1], [0, 0, 1, 1], [], []>} : vector<8x8xf32>, vector<8x32xf32>, vector<8x32xf32> -> vector<8x32xf32>
    %41 = arith.addf %39, %40 : vector<8x32xf32>
    %c0_27 = arith.constant 0 : index
    %c0_28 = arith.constant 0 : index
    %42 = vector.load %arg11[%c0_27, %c0_28] : memref<8x32xf32, #tpu.memory_space<vmem>>, vector<8x32xf32>
    tpu.vector_store %arg11[%c0_27, %c0_28], %41 {strides = array<i32>} : memref<8x32xf32, #tpu.memory_space<vmem>>, vector<8x32xf32>,
    %c0_29 = arith.constant 0 : index
    %c0_30 = arith.constant 0 : index
    %43 = vector.load %arg9[%c0_29, %c0_30] : memref<8x1xf32, #tpu.memory_space<vmem>>, vector<8x1xf32>
    tpu.vector_store %arg9[%c0_29, %c0_30], %25 {strides = array<i32>} : memref<8x1xf32, #tpu.memory_space<vmem>>, vector<8x1xf32>,
    %c0_i32_31 = arith.constant 0 : i32
    %44 = arith.cmpi eq, %arg2, %c0_i32_31 : i32
    %45 = arith.extui %44 : i1 to i32
    %c0_i32_32 = arith.constant 0 : i32
    %46 = arith.cmpi ne, %45, %c0_i32_32 : i32
    scf.if %46 {
      %c0_33 = arith.constant 0 : index
      %c0_34 = arith.constant 0 : index
      %47 = vector.load %arg10[%c0_33, %c0_34] : memref<8x1xf32, #tpu.memory_space<vmem>>, vector<8x1xf32>
      %48 = tpu.reciprocal %47 {approx = true} : vector<8x1xf32> -> vector<8x1xf32>
      %c0_35 = arith.constant 0 : index
      %c0_36 = arith.constant 0 : index
      %49 = vector.load %arg11[%c0_35, %c0_36] : memref<8x32xf32, #tpu.memory_space<vmem>>, vector<8x32xf32>
      %50 = vector.broadcast %48 : vector<8x1xf32> to vector<8x32xf32>
      %51 = arith.mulf %49, %50 : vector<8x32xf32>
      %c0_37 = arith.constant 0 : index
      %c0_38 = arith.constant 0 : index
      %c0_39 = arith.constant 0 : index
      %52 = vector.load %arg7[%c0_37, %c0_38, %c0_39] : memref<1x8x32xf32, #tpu.memory_space<vmem>>, vector<1x8x32xf32>
      %53 = vector.shape_cast %52 : vector<1x8x32xf32> to vector<8x32xf32>
      %54 = vector.shape_cast %51 : vector<8x32xf32> to vector<1x8x32xf32>
      tpu.vector_store %arg7[%c0_37, %c0_38, %c0_39], %54 {strides = array<i32>} : memref<1x8x32xf32, #tpu.memory_space<vmem>>, vector<1x8x32xf32>,
      %c0_40 = arith.constant 0 : index
      %c0_41 = arith.constant 0 : index
      %55 = vector.load %arg9[%c0_40, %c0_41] : memref<8x1xf32, #tpu.memory_space<vmem>>, vector<8x1xf32>
      %c0_42 = arith.constant 0 : index
      %c0_43 = arith.constant 0 : index
      %c0_44 = arith.constant 0 : index
      %56 = vector.load %arg12[%c0_42, %c0_43, %c0_44] : memref<1x8x8xf32, #tpu.memory_space<vmem>>, vector<1x8x8xf32>
      %57 = vector.shape_cast %56 : vector<1x8x8xf32> to vector<8x8xf32>
      %58 = vector.broadcast %55 : vector<8x1xf32> to vector<8x8xf32>
      %59 = arith.subf %57, %58 : vector<8x8xf32>
      %60 = math.exp %59 : vector<8x8xf32>
      %61 = vector.broadcast %48 : vector<8x1xf32> to vector<8x8xf32>
      %62 = arith.mulf %60, %61 : vector<8x8xf32>
      %c0_45 = arith.constant 0 : index
      %c0_46 = arith.constant 0 : index
      %c0_47 = arith.constant 0 : index
      %63 = vector.load %arg8[%c0_45, %c0_46, %c0_47] : memref<1x8x8xf32, #tpu.memory_space<vmem>>, vector<1x8x8xf32>
      %64 = vector.shape_cast %63 : vector<1x8x8xf32> to vector<8x8xf32>
      %65 = vector.shape_cast %62 : vector<8x8xf32> to vector<1x8x8xf32>
      tpu.vector_store %arg8[%c0_45, %c0_46, %c0_47], %65 {strides = array<i32>} : memref<1x8x8xf32, #tpu.memory_space<vmem>>, vector<1x8x8xf32>,
    } else {
    }
    return
  }
  func.func @transform_0(%arg0: i32, %arg1: i32, %arg2: i32) -> (i32, i32, i32) {
    %c0_i32 = arith.constant 0 : i32
    %c0_i32_0 = arith.constant 0 : i32
    return %arg0, %arg1, %c0_i32 : i32, i32, i32
  }
  func.func @transform_1(%arg0: i32, %arg1: i32, %arg2: i32) -> (i32, i32, i32) {
    %c0_i32 = arith.constant 0 : i32
    %c0_i32_0 = arith.constant 0 : i32
    return %arg0, %arg2, %c0_i32 : i32, i32, i32
  }
  func.func @transform_2(%arg0: i32, %arg1: i32, %arg2: i32) -> (i32, i32, i32) {
    %c0_i32 = arith.constant 0 : i32
    %c0_i32_0 = arith.constant 0 : i32
    return %arg0, %arg2, %c0_i32 : i32, i32, i32
  }
  func.func @transform_3(%arg0: i32, %arg1: i32, %arg2: i32) -> (i32, i32, i32) {
    %c0_i32 = arith.constant 0 : i32
    return %arg0, %arg1, %arg2 : i32, i32, i32
  }
  func.func @transform_4(%arg0: i32, %arg1: i32, %arg2: i32) -> (i32, i32, i32) {
    %c0_i32 = arith.constant 0 : i32
    %c0_i32_0 = arith.constant 0 : i32
    return %arg0, %arg1, %c0_i32 : i32, i32, i32
  }
  func.func @transform_5(%arg0: i32, %arg1: i32, %arg2: i32) -> (i32, i32, i32) {
    %c0_i32 = arith.constant 0 : i32
    %c0_i32_0 = arith.constant 0 : i32
    return %arg0, %arg1, %c0_i32 : i32, i32, i32
  }
}

</mosaic_0001>

<bundles_post_ra>
// kernel: tpu_custom_call.1
= control target key start
LH: loop header
LB: loop body
LE: loop exit
PB: predicated region body
PF: predicated region fallthrough
CT: control target
= control target key end

     0   :  { %s1470_s0 = inlined_call_operand.hbm [shape: f32[2,8,32], index: 0, kind: input, shape index: {}]   ;;  %s1471_s1 = inlined_call_operand.hbm [shape: f32[2,8,32], index: 1, kind: input, shape index: {}]   ;;  %s1472_s2 = inlined_call_operand.hbm [shape: f32[2,8,32], index: 2, kind: input, shape index: {}]   ;;  %s1473_s3 = inlined_call_operand.vmem [shape: s8[2,8,8], index: 3, kind: input, shape index: {}]   ;;  %s1474_s4 = inlined_call_operand.hbm [shape: f32[2,8,32], index: 4, kind: output, shape index: {0}]   ;;  %s1475_s5 = inlined_call_operand.hbm [shape: f32[2,8,8], index: 5, kind: output, shape index: {1}]  }
   0x1   :  { %1481 = sst [smem:[#allocation23_spill]] %s1471_s1 }
   0x2   :  { %11 = vsyncpa [#allocation7], 0 }
   0x3   :  { %13 = vsyncpa [#allocation7 + $0x1], 0 }
   0x4   :  { %14 = vsyncpa [#allocation10], 0 }
   0x5   :  { %16 = vsyncpa [#allocation10 + $0x1], 0 }
   0x6   :  { %17 = vsyncpa [#allocation8], 0 }
   0x7   :  { %19 = vsyncpa [#allocation8 + $0x1], 0 }
   0x8   :  { %20 = vsyncpa [#allocation14], 0 }
   0x9   :  { %22 = vsyncpa [#allocation14 + $0x1], 0  ;;  %s1212_s18 = smov 0   ;;  %s1214_s19 = smov 0  }
   0xa   :  { %s1216_s20 = smov 0   ;;  %s1218_s21 = smov 0  }
   0xb   :  { %s1220_s22 = smov 0   ;;  %s1222_s23 = smov 0  }
   0xc LB: > { %1482 = sst [smem:[#allocation19_spill]] %s1167_s22  ;;  %s1243_s24 = sadd.s32 4294967295, %s1171_s23   ;;  %s1171_s23 = sphi %s1222_s23, %s28_s23   ;;  %s1167_s22 = sphi %s1220_s22, %s1498_s22   ;;  %s1163_s21 = sphi %s1218_s21, %s1497_s21   ;;  %s1159_s20 = sphi %s1216_s20, %s1501_s20   ;;  %s1155_s19 = sphi %s1214_s19, %s1500_s19   ;;  %s1151_s18 = sphi %s1212_s18, %s1499_s18  }
   0xd   : > { %1483 = sst [smem:[#allocation20_spill]] %s1171_s23  ;;  %s843_s25 = sadd.s32 4294967294, %s1171_s23  }
   0xe   : > { %s47_s26 = sadd.s32 1, %s1167_s22  ;;  %s56_s27 = sadd.s32 1, %s1159_s20 }
   0xf   : > { %p49_p0 = scmp.ge.s32.totalorder %s47_s26, 2  ;;  %p63_p1 = scmp.ne.s32.totalorder %s1159_s20, %s1155_s19 }
  0x10   : > { %p64_p2 = scmp.eq.s32.totalorder %s1171_s23, 0  ;;  %p69_p3 = scmp.ne.s32.totalorder %s1155_s19, %s1151_s18 }
  0x11   : > { %s1503_s26 = smov (%p49_p0, %s47_s26), 0  ;;  %p70_p5 = scmp.eq.s32.totalorder %s1243_s24, 0 }
  0x12   : > { %1484 = sst [smem:[#allocation21_spill]] %s1503_s26  ;;  %p1255_p4 = por %p64_p2, %p63_p1 }
  0x13   : > { %s51_s29 = ssub.s32 %s1167_s22, %s1503_s26  ;;  %p181_p6 = scmp.eq.s32.totalorder %s1243_s24, 1 }
  0x14   : > { %p54_p7 = scmp.eq.s32.totalorder %s51_s29, 0  ;;  %p1263_p8 = por %p70_p5, %p69_p3 }
  0x15   : > { %p1267_p9 = por %p181_p6, %p63_p1  ;;  %p187_p10 = scmp.eq.s32.totalorder %s843_s25, 1 }
  0x16   : > { %s1272_s7 = scalar_select %p54_p7, %s1159_s20, %s56_s27  }
  0x17   : > { %p1274_p11 = por %p187_p10, %p69_p3  ;;  %p909_p13 = scmp.lt.s32.totalorder %s1171_s23, 2 }
  0x18   : > { %1488 = sst [smem:[#allocation22_spill]] %s1272_s7  ;;  %s1476_s9 = sand.u32 1, %s1159_s20  }
  0x19   : > { %s1283_s10 = sshll.u32 %s1476_s9, 3  ;;  %s1286_s11 = sshll.u32 %s1167_s22, 7 }
  0x1a   : > { %p1290_p0 = pnand %p909_p13, %p1255_p4  ;;  %s254_s13 = sand.u32 1, %s1171_s23  }
  0x1b   : > { %s1491_s1 = sld [smem:[#allocation23_spill]]  ;;  %s258_s17 = scalar_lea.vmem [#allocation9], %s1283_s10 }
  0x1c   : > { %s266_s25 = sshll.u32 %s258_s17, 4  ;;  %p852_p1 = scmp.ge.s32.totalorder %s1171_s23, 1  ;;  %s267_s25 = int_to_ptr.vmem [resolvable:$true] %s266_s25 }
  0x1d   : > { %p303_p2 = scmp.lt.s32.totalorder %s1171_s23, 3  ;;  %s1302_s27 = scalar_lea.sflag [#allocation10], %s254_s13 }
  0x1e   : > { %p975_p3 = pneg %p1290_p0  ;;  %s986_s28 = scalar_lea.vmem %s267_s25, 128 }
  0x1f   : > { %p987_p4 = scmp.ne.s32.totalorder %s267_s25, %s986_s28  ;;  %s1173_s29 = smov [#allocation9]  }
  0x20   : > { %s991_s9 = sshll.u32 %s1173_s29, 4  ;;  %s992_s9 = int_to_ptr.vmem [resolvable:$false] %s991_s9 }
  0x21   : > { %s264_s16 = scalar_lea.hbm %s1491_s1, %s1286_s11  ;;  %p989_p5 = pnand %p987_p4, %p975_p3 }
  0x22   : > { %s993_s14 = scalar_lea.vmem %s992_s9, 256  ;;  %p994_p7 = scmp.lt.s32.totalorder %s267_s25, %s992_s9 }
  0x23   : > { %p990_p6 = pneg %p989_p5  ;;  %p995_p10 = scmp.lt.s32.totalorder %s993_s14, %s986_s28 }
  0x25   : > { %p996_p13 = por %p995_p10, %p994_p7 }
  0x27   : > { %p997_p12 = pnand %p996_p13, %p990_p6 }
  0x29   : > { %1000 = shalt.err (!%p997_p12)
}
  0x2a   : > { %898 = dma.hbm_to_vmem [thread:$0]  (!%p1290_p0), %s264_s16, 128, %s267_s25, %s1302_s27  }
  0x2b   : > { %p1316_p4 = pnand %p852_p1, %p303_p2  ;;  %s245_s17 = scalar_lea.hbm %s1470_s0, %s1286_s11 }
  0x2c   : > { %s239_s28 = scalar_lea.vmem [#allocation6], %s1283_s10  ;;  %s283_s26 = scalar_lea.hbm %s1472_s2, %s1286_s11 }
  0x2d   : > { %s247_s29 = sshll.u32 %s239_s28, 4  ;;  %s1493_s22 = sand.u32 1, %s1159_s20   ;;  %s248_s29 = int_to_ptr.vmem [resolvable:$true] %s247_s29 }
  0x2e   : > { %s236_s7 = scalar_lea.sflag [#allocation7], %s1493_s22  ;;  %s1014_s16 = scalar_lea.vmem %s248_s29, 128 }
  0x2f   : > { %p1015_p12 = scmp.ne.s32.totalorder %s248_s29, %s1014_s16  ;;  %s1174_s25 = smov [#allocation6]  }
  0x30   : > { %s1019_s23 = sshll.u32 %s1174_s25, 4  ;;  %s1020_s23 = int_to_ptr.vmem [resolvable:$false] %s1019_s23 }
  0x31   : > { %p1017_p1 = pnand %p1015_p12, %p975_p3  ;;  %s1021_s9 = scalar_lea.vmem %s1020_s23, 256 }
  0x32   : > { %p1022_p5 = scmp.lt.s32.totalorder %s248_s29, %s1020_s23  ;;  %p1023_p6 = scmp.lt.s32.totalorder %s1021_s9, %s1014_s16 }
  0x33   : > { %p1018_p2 = pneg %p1017_p1 }
  0x34   : > { %p1024_p7 = por %p1023_p6, %p1022_p5 }
  0x36   : > { %p1025_p10 = pnand %p1024_p7, %p1018_p2 }
  0x38   : > { %1028 = shalt.err (!%p1025_p10)
}
  0x39   : > { %895 = dma.hbm_to_vmem [thread:$0]  (!%p1290_p0), %s245_s17, 128, %s248_s29, %s236_s7  }
  0x3a   : > { %s277_s1 = scalar_lea.vmem [#allocation11], %s1283_s10  ;;  %s1175_s28 = smov [#allocation11]  }
  0x3b   : > { %s285_s22 = sshll.u32 %s277_s1, 4  ;;  %s1047_s23 = sshll.u32 %s1175_s28, 4  ;;  %s286_s22 = int_to_ptr.vmem [resolvable:$true] %s285_s22  ;;  %s1048_s23 = int_to_ptr.vmem [resolvable:$false] %s1047_s23 }
  0x3c   : > { %s1042_s15 = scalar_lea.vmem %s286_s22, 128  ;;  %s1049_s14 = scalar_lea.vmem %s1048_s23, 256 }
  0x3d   : > { %p1043_p13 = scmp.ne.s32.totalorder %s286_s22, %s1042_s15  ;;  %p1050_p2 = scmp.lt.s32.totalorder %s286_s22, %s1048_s23 }
  0x3e   : > { %p1051_p5 = scmp.lt.s32.totalorder %s1049_s14, %s1042_s15 }
  0x3f   : > { %p1045_p12 = pnand %p1043_p13, %p975_p3 }
  0x40   : > { %p1052_p6 = por %p1051_p5, %p1050_p2 }
  0x41   : > { %p1046_p1 = pneg %p1045_p12 }
  0x43   : > { %p1053_p7 = pnand %p1052_p6, %p1046_p1 }
  0x45   : > { %1056 = shalt.err (!%p1053_p7)
}
  0x46   : > { %901 = dma.hbm_to_vmem [thread:$0]  (!%p1290_p0), %s283_s26, 128, %s286_s22, %s1302_s27  }
  0x47   : > { %307 = sbr.rel (%p1316_p4) target bundleno = 888 (0x378), region = 36  ;;  %s1351_s17 = sand.u32 (!%p1316_p4), 1, %s1155_s19  }
  0x48   : > { %s1354_s29 = sshll.u32 (!%p1316_p4), %s1351_s17, 3  ;;  %s310_s12 = scalar_lea.sflag (!%p1316_p4), [#allocation7], %s1351_s17 }
  0x49   : > { %s313_s16 = scalar_lea.vmem (!%p1316_p4), [#allocation6], %s1354_s29 }
  0x4c   : > { %1134 = dma.done.wait (%p1263_p8), %s310_s12, 128  }
  0x4d   : > { %1136 = vsyncadd (%p1263_p8), %s310_s12, 4294967168  ;;  %s318_s26 = sand.u32 1, %s1243_s24   ;;  %s322_s27 = scalar_lea.vmem [#allocation9], %s1354_s29 }
  0x4e   : > { %s319_s11 = scalar_lea.sflag [#allocation10], %s318_s26 }
  0x4f   : > { %1138 = dma.done.wait (%p1263_p8), %s319_s11, 256  }
  0x50   : > { %1140 = vsyncadd (%p1263_p8), %s319_s11, 4294967040  ;;  %vm402_vm0 = vcmask 261120   ;;  %v1176_v0 = vmov 0.0   ;;  %vm1177_vm1 = vmmov 0   ;;  %v406_v1 = vld [vmem:[%s322_s27] sm:$0xff]  ;;  %v404_v2 = vld [vmem:[%s313_s16] sm:$0xff] }
  0x51   : > { %872 = vmatprep.subr.mxu0 %v1176_v0  ;;  %403 = vst.msk [vmem:[#allocation4] sm:$0xff] %vm402_vm0, %v1176_v0  ;;  %874 = vmatprep.mubr.msk.f32.mxu0 %vm1177_vm1, %v1176_v0  ;;  %v405_v3 = vmul.f32 0.17677669, %v404_v2  ;;  %v1178_v4 = vmov 0   ;;  %vm399_vm2 = vcmask 7168   ;;  %v1179_v5 = vmov -inf  }
  0x52   : > { %877 = vmatprep.subr.mxu1 %v1176_v0  ;;  %879 = vmatprep.mubr.msk.f32.mxu1 %vm1177_vm1, %v1176_v0  ;;  %400 = vst.msk [vmem:[#allocation2] sm:$0xff] %vm399_vm2, %v1179_v5  ;;  %401 = vst.msk [vmem:[#allocation3] sm:$0xff] %vm399_vm2, %v1176_v0  ;;  %p383_p8 = scmp.lt.s32.totalorder %s1163_s21, 1  ;;  %vm493_vm5 = vcmask 64512   ;;  %s331_s1 = scalar_lea.vmem [#allocation11], %s1354_s29 }
  0x53   : > { %873 = vmatpush3.xpose.msk.msra.mxu0 %vm402_vm0, %v406_v1  ;;  %963 = vset.pattern.permute.xlu0 %v1178_v4  ;;  %v407_v17 = vld [vmem:[%s331_s1] sm:$0xff]  ;;  %s864_s22 = sshll.u32 %s1163_s21, 7  ;;  %s375_s15 = scalar_lea.vmem [#allocation12], %s1354_s29 }
  0x54   : > { %964 = vset.pattern.permute.xlu1 %v1178_v4  ;;  %s384_s24 = scalar_select %p383_p8, %s1163_s21, 1  ;;  %878 = vmatpush3.msra.mxu1 %v407_v17 }
  0x55   : > { %s647_s28 = sshll.u32 %s375_s15, 4  ;;  %s382_s23 = scalar_lea.vmem [#allocation13], %s1354_s29  ;;  %s1394_s28 = int_to_ptr.vmem [resolvable:$true] %s647_s28 }
  0x56   : > { %875 = vmatmul.mubr.msk.f32.vlgmr.msra.gmra.mxu0 %vm402_vm0, %v405_v3  ;;  %s858_s30 = sshll.u32 %s384_s24, 1  ;;  %s661_s14 = sshll.u32 %s382_s23, 4  ;;  %s1401_s14 = int_to_ptr.vmem [resolvable:$true] %s661_s14 }
  0x57   : > { %s392_s9 = scalar_lea.vmem %s1473_s3, %s858_s30  ;;  %s1392_s12 = scalar_lea.hbm %s1474_s4, %s864_s22 }
  0x58   : > { %v485_v6 = vld [vmem:[%s392_s9] sm:$0x3]  ;;  %v519_v33 = vld [vmem:[#allocation4] sm:$0xff]  ;;  %s1399_s29 = scalar_lea.hbm %s1475_s5, %s864_s22  ;;  %s628_s26 = scalar_lea.sflag [#allocation8], %s1351_s17 }
  0x59   : > { %vm486_vm3 = vnez %v485_v6  ;;  %v495_v13 = vld [vmem:[#allocation2] sm:$0xff]  ;;  %v511_v26 = vld [vmem:[#allocation3] sm:$0xff]  ;;  %s1057_s11 = scalar_lea.vmem %s1394_s28, 128  ;;  %s1180_s27 = smov [#allocation12]  }
  0x5a   : > { %v487_v7 = vsel %vm486_vm3, 16843009, %v1178_v4  ;;  %p1058_p0 = scmp.ne.s32.totalorder %s1394_s28, %s1057_s11  ;;  %s1061_s24 = sshll.u32 %s1180_s27, 4  ;;  %s1062_s24 = int_to_ptr.vmem [resolvable:$false] %s1061_s24 }
  0x5b   : > { %v488_v8 = vunpack.c.0.s8 %v487_v7  ;;  %s1063_s30 = scalar_lea.vmem %s1062_s24, 256  ;;  %p1064_p10 = scmp.lt.s32.totalorder %s1394_s28, %s1062_s24 }
  0x5c   : > { %p1059_p3 = pnand %p1058_p0, %p1267_p9  ;;  %p1065_p13 = scmp.lt.s32.totalorder %s1063_s30, %s1057_s11 }
  0x5d   : > { %vm489_vm4 = vcmp.ne.s32.totalorder %v488_v8, 0 }
  0x5e   : > { %p1060_p4 = pneg %p1059_p3  ;;  %p1066_p12 = por %p1065_p13, %p1064_p10 }
  0x60   : > { %p1067_p1 = pnand %p1066_p12, %p1060_p4 }
 0x116   : > { %v481_v9 = vpop.f32.mrf.mxu0 }
 0x117   : > { %v490_v10 = vsel %vm489_vm4, -1e+30, %v481_v9 }
 0x118   : > { %494 = vst.msk [vmem:[#allocation5] sm:$0xff] %vm493_vm5, %v490_v10  ;;  %v876_v11 = vpop.f32.mrf.mxu0  ;;  %v496_v12 = vsel %vm493_vm5, %v490_v10, -inf }
 0x119   : > { %497 = vmax.xlane.f32.xlu0 %v496_v12 }
 0x11f   : > { %v616_v39 = vld [vmem:[#allocation5] sm:$0xff] }
 0x1a2   : > { %v498_v14 = vpop.xlane.xlu0 %497 }
 0x1a3   : > { %v499_v15 = vmax.f32 %v495_v13, %v498_v14 }
 0x1a5   : > { %v500_v16 = vsub.f32 %v495_v13, %v499_v15  ;;  %601 = vst.msk [vmem:[#allocation2] sm:$0xff] %vm399_vm2, %v499_v15  ;;  %505 = vperm.xlu0 %963, %v499_v15  }
 0x1a7   : > { %v501_v23 = vmul.f32 1.442695, %v500_v16 }
 0x1ac   : > { %v615_v24 = vld [vmem:[#allocation2] sm:$0xff] }
 0x220   : > { %v506_v18 = vpop.permute.xlu0 %505 }
 0x221   : > { %v508_v19 = vsub.f32 %v490_v10, %v506_v18 }
 0x223   : > { %v509_v20 = vmul.f32 1.442695, %v508_v19 }
 0x225   : > { %965 = vpow2.f32 %v509_v20 }
 0x226   : > { %967 = vpow2.f32 %v501_v23 }
 0x232   : > { %v966_v21 = vpop.eup %965 }
 0x233   : > { %880 = vmatmul.mubr.msk.f32.vlgmr.msra.gmra.mxu1 %vm493_vm5, %v966_v21  ;;  %v513_v22 = vsel %vm493_vm5, %v966_v21, 0.0  ;;  %v968_v25 = vpop.eup %967 }
 0x234   : > { %514 = vadd.xlane.f32.xlu1 %v513_v22  ;;  %v512_v27 = vmul.f32 %v968_v25, %v511_v26 }
 0x245   : > { %619 = vperm.xlu1 %964, %v615_v24  }
 0x249   : > { %522 = vperm.xlu1 %964, %v968_v25  }
 0x2bd   : > { %v515_v28 = vpop.xlane.xlu1 %514 }
 0x2be   : > { %v516_v29 = vadd.f32 %v515_v28, %v512_v27 }
 0x2c0   : > { %518 = vst.msk [vmem:[#allocation3] sm:$0xff] %vm399_vm2, %v516_v29 }
 0x2c1   : > { %v620_v32 = vpop.permute.xlu1 %619 }
 0x2c2   : > { %v622_v40 = vsub.f32 %v616_v39, %v620_v32 }
 0x2c4   : > { %v623_v41 = vmul.f32 1.442695, %v622_v40 }
 0x2c5   : > { %v523_v34 = vpop.permute.xlu1 %522 }
 0x2c6   : > { %v525_v35 = vmul.f32 %v523_v34, %v519_v33 }
 0x2c7   : > { %v605_v30 = vld [vmem:[#allocation3] sm:$0xff] }
 0x2c8   : > { %969 = vrcp.f32 %v605_v30 }
 0x2c9   : > { %971 = vpow2.f32 %v623_v41 }
 0x2d5   : > { %v970_v31 = vpop.eup %969 }
 0x2d6   : > { %610 = vperm.xlu1 %964, %v970_v31   ;;  %v972_v42 = vpop.eup %971 }
 0x2f3   : > { %v595_v36 = vpop.f32.mrf.mxu1 }
 0x2f4   : > { %v599_v37 = vadd.f32 %v595_v36, %v525_v35 }
 0x2f5   : > { %v881_v38 = vpop.f32.mrf.mxu1 }
 0x2f6   : > { %600 = vst.msk [vmem:[#allocation4] sm:$0xff] %vm402_vm0, %v599_v37 }
 0x2fd   : > { %v607_v43 = vld [vmem:[#allocation4] sm:$0xff] }
 0x351   : > { %v611_v44 = vpop.permute.xlu1 %610 }
 0x352   : > { %v613_v45 = vmul.f32 %v611_v44, %v607_v43  ;;  %v625_v46 = vmul.f32 %v972_v42, %v611_v44 }
 0x354   : > { %614 = vst.msk [vmem:[%s375_s15] sm:$0xff] %vm402_vm0, %v613_v45 }
 0x355   : > { %626 = vst.msk [vmem:[%s382_s23] sm:$0xff] %vm493_vm5, %v625_v46 }
 0x356   : > { %1070 = shalt.err (!%p1067_p1)
}
 0x357   : > { %s1071_s13 = scalar_lea.hbm %s1392_s12, 128  ;;  %s1075_s1 = scalar_lea.hbm %s1474_s4, 256 }
 0x358   : > { %p1072_p2 = scmp.ne.s32.totalorder %s1392_s12, %s1071_s13  ;;  %p1076_p7 = scmp.lt.s32.totalorder %s1392_s12, %s1474_s4 }
 0x359   : > { %p1077_p8 = scmp.lt.s32.totalorder %s1075_s1, %s1071_s13 }
 0x35a   : > { %p1073_p5 = pnand %p1072_p2, %p1267_p9 }
 0x35b   : > { %p1078_p0 = por %p1077_p8, %p1076_p7 }
 0x35c   : > { %p1074_p6 = pneg %p1073_p5 }
 0x35e   : > { %p1079_p3 = pnand %p1078_p0, %p1074_p6 }
 0x360   : > { %1082 = shalt.err (!%p1079_p3)
}
 0x361   : > { %888 = dma.vmem_to_hbm [thread:$0]  (%p1267_p9), %s1394_s28, 128, %s1392_s12, %s628_s26  }
 0x362   : > { %s633_s23 = scalar_lea.sflag [#allocation14], %s1351_s17  ;;  %s1083_s7 = scalar_lea.vmem %s1401_s14, 128 }
 0x363   : > { %p1084_p4 = scmp.ne.s32.totalorder %s1401_s14, %s1083_s7  ;;  %s1181_s10 = smov [#allocation13]  }
 0x364   : > { %s1087_s16 = sshll.u32 %s1181_s10, 4  ;;  %s1088_s16 = int_to_ptr.vmem [resolvable:$false] %s1087_s16 }
 0x365   : > { %p1085_p10 = pnand %p1084_p4, %p1267_p9  ;;  %s1089_s21 = scalar_lea.vmem %s1088_s16, 256 }
 0x366   : > { %p1090_p12 = scmp.lt.s32.totalorder %s1401_s14, %s1088_s16  ;;  %p1091_p1 = scmp.lt.s32.totalorder %s1089_s21, %s1083_s7 }
 0x367   : > { %p1086_p13 = pneg %p1085_p10 }
 0x368   : > { %p1092_p2 = por %p1091_p1, %p1090_p12 }
 0x36a   : > { %p1093_p5 = pnand %p1092_p2, %p1086_p13 }
 0x36c   : > { %1096 = shalt.err (!%p1093_p5)
}
 0x36d   : > { %s1097_s28 = scalar_lea.hbm %s1399_s29, 128  ;;  %s1101_s26 = scalar_lea.hbm %s1475_s5, 256 }
 0x36e   : > { %p1098_p6 = scmp.ne.s32.totalorder %s1399_s29, %s1097_s28  ;;  %p1102_p0 = scmp.lt.s32.totalorder %s1399_s29, %s1475_s5 }
 0x36f   : > { %p1103_p3 = scmp.lt.s32.totalorder %s1101_s26, %s1097_s28 }
 0x370   : > { %p1099_p7 = pnand %p1098_p6, %p1267_p9 }
 0x371   : > { %p1104_p4 = por %p1103_p3, %p1102_p0 }
 0x372   : > { %p1100_p8 = pneg %p1099_p7 }
 0x374   : > { %p1105_p10 = pnand %p1104_p4, %p1100_p8 }
 0x376   : > { %1108 = shalt.err (!%p1105_p10)
}
 0x377   : > { %889 = dma.vmem_to_hbm [thread:$0]  (%p1267_p9), %s1401_s14, 128, %s1399_s29, %s633_s23  }
 0x378 PF: > { %s1494_s24 = sld [smem:[#allocation20_spill]]  ;;  %s673_s30 = sand.u32 1, %s1151_s18  }
 0x379   : > { %s674_s13 = scalar_lea.sflag [#allocation8], %s673_s30 }
 0x37e   : > { %p1495_p13 = scmp.ge.s32.totalorder %s1494_s24, 2 }
 0x380   : > { %p903_p12 = pnand %p1495_p13, %p1274_p11 }
 0x382   : > { %p904_p1 = pneg %p903_p12 }
 0x384   : > { %1142 = dma.done.wait (%p904_p1), %s674_s13, 128  }
 0x385   : > { %1144 = vsyncadd (%p904_p1), %s674_s13, 4294967168  ;;  %s683_s25 = scalar_lea.sflag [#allocation14], %s673_s30 }
 0x386   : > { %1146 = dma.done.wait (%p904_p1), %s683_s25, 128  }
 0x387   : > { %1148 = vsyncadd (%p904_p1), %s683_s25, 4294967168  ;;  %s28_s23 = sadd.s32 1, %s1494_s24   ;;  %s1496_s6 = sld [smem:[#allocation22_spill]] }
 0x388   : > { %p25_p2 = scmp.ge.s32.totalorder %s28_s23, 4   ;;  %s1497_s21 = sld [smem:[#allocation19_spill]] }
 0x389   : > { %s1498_s22 = sld [smem:[#allocation21_spill]]  ;;  %s1499_s18 = smov %s1155_s19 }
 0x38a   : > { %s1500_s19 = smov %s1159_s20  ;;  %27 = sbr.rel (!%p25_p2) target bundleno = 12 (0xc), region = 134 }
 0x38d   : > { %s1501_s20 = smov %s1496_s6 }
 0x38f   :  { %688 = vsyncpa [#allocation7], 1 }
 0x390   :  { %690 = vsyncpa [#allocation7 + $0x1], 1 }
 0x391   :  { %691 = vsyncpa [#allocation10], 1 }
 0x392   :  { %693 = vsyncpa [#allocation10 + $0x1], 1 }
 0x393   :  { %694 = vsyncpa [#allocation8], 1 }
 0x394   :  { %696 = vsyncpa [#allocation8 + $0x1], 1 }
 0x395   :  { %697 = vsyncpa [#allocation14], 1 }
 0x396   :  { %699 = vsyncpa [#allocation14 + $0x1], 1 }

</bundles_post_ra>
